<compile_context>
chip_gen: v7x
topology: tpu7x:2x2x1
jax: 0.10.0
libtpu: 0.0.40
codegen_flags: <defaults>
</compile_context>

<pallas_src>
import math
from functools import partial

import jax
import jax.numpy as jnp
from jax.experimental import pallas as pl
from jax.experimental.pallas import tpu as pltpu


# ----------------------------- tiling helpers ------------------------------

_LANE = 128
_TARGET_TILE_BYTES = 4 * 1024 * 1024   # ~4 MiB input tiles -> near HBM roofline
_VMEM_LIMIT_BYTES = 48 * 1024 * 1024   # safe on v7x (64 MiB physical), fine on v5e/v6e
_MIN_GRID_STEPS = 4                    # >= 2 pipelined steps per TC on v7x megacore


def _row_align(itemsize):
    # sub-32-bit dtypes pack 2 (bf16/f16) or 4 (int8/fp8) rows per sublane
    return 8 * max(1, 4 // max(1, itemsize))


def _pick_rows(R, row_bytes, itemsize):
    """Rows per block: ~4 MiB tiles, packing-aligned, >= _MIN_GRID_STEPS steps."""
    align = _row_align(itemsize)
    if R <= align:
        return R                                   # full extent is always legal
    rows = max(1, _TARGET_TILE_BYTES // max(1, row_bytes))
    if R >= _MIN_GRID_STEPS * align:
        rows = min(rows, R // _MIN_GRID_STEPS)     # keep the 2 v7x cores pipelined
    rows = max(align, (rows // align) * align)
    return min(rows, R)


def _pick_lanes(L, rows, itemsize):
    """Lane-axis tile so one (rows, BL) input tile stays near the target bytes."""
    if L <= _LANE or rows * L * itemsize <= _TARGET_TILE_BYTES:
        return L
    bl = max(1, _TARGET_TILE_BYTES // max(1, rows * itemsize))
    bl = max(_LANE, (bl // _LANE) * _LANE)
    return min(bl, L)


def _pick_tiles(R, L, itemsize):
    rows = _pick_rows(R, L * itemsize, itemsize)
    lanes = _pick_lanes(L, rows, itemsize)
    return rows, lanes


def _cparams(semantics):
    return pltpu.CompilerParams(dimension_semantics=semantics,
                                vmem_limit_bytes=_VMEM_LIMIT_BYTES)


# ----------------------------- Pallas kernels ------------------------------

def _row_sum_kernel(x_ref, o_ref, *, l_total, bl):
    """Per-row spatial mean; L-tiled, f32 accumulation in the resident out block."""
    j = pl.program_id(1)

    @pl.when(j == 0)
    def _init():
        o_ref[...] = jnp.zeros_like(o_ref)

    x = x_ref[...].astype(jnp.float32)
    if l_total % bl != 0:
        # mask the padded lanes of the last (partial) L tile
        col = jax.lax.broadcasted_iota(jnp.int32, x.shape, 1) + j * bl
        x = jnp.where(col < l_total, x, 0.0)
    o_ref[...] = o_ref[...] + jnp.sum(x, axis=-1, keepdims=True)

    @pl.when(j == pl.num_programs(1) - 1)
    def _finalize():
        o_ref[...] = o_ref[...] * (1.0 / l_total)


def _normalize_rows_kernel(x_ref, p_ref, o_ref):
    """o = x*scale + shift with per-ROW params p = (BR, 2): [:,0]=scale, [:,1]=shift."""
    x = x_ref[...].astype(jnp.float32)
    o_ref[...] = (x * p_ref[:, 0:1] + p_ref[:, 1:2]).astype(o_ref.dtype)


def _normalize_lanes_kernel(x_ref, p_ref, o_ref):
    """o = x*scale + shift with per-LANE params p = (2, BW): [0]=scale, [1]=shift."""
    x = x_ref[...].astype(jnp.float32)
    o_ref[...] = (x * p_ref[0:1, :] + p_ref[1:2, :]).astype(o_ref.dtype)


# --------------------------- pallas_call wrappers ---------------------------

def row_mean(x2, tiles=None):
    """s[r] = mean_l x2[r, l]  -- Pallas, f32 accumulation, L-tiled when needed."""
    R, L = x2.shape
    br, bl = tiles if tiles is not None else _pick_tiles(R, L, x2.dtype.itemsize)
    grid = (pl.cdiv(R, br), pl.cdiv(L, bl))
    return pl.pallas_call(
        partial(_row_sum_kernel, l_total=L, bl=bl),
        grid=grid,
        in_specs=[pl.BlockSpec((br, bl), lambda i, j: (i, j))],
        out_specs=pl.BlockSpec((br, 1), lambda i, j: (i, 0)),
        out_shape=jax.ShapeDtypeStruct((R, 1), jnp.float32),
        compiler_params=_cparams(("parallel", "arbitrary")),
    )(x2)


def normalize_rows(x2, params, out_dtype, tiles=None):
    """out[r, l] = x2[r, l] * params[r, 0] + params[r, 1]  (row-layout hot path)."""
    R, L = x2.shape
    br, bl = tiles if tiles is not None else _pick_tiles(R, L, x2.dtype.itemsize)
    grid = (pl.cdiv(R, br), pl.cdiv(L, bl))
    return pl.pallas_call(
        _normalize_rows_kernel,
        grid=grid,
        in_specs=[pl.BlockSpec((br, bl), lambda i, j: (i, j)),
                  pl.BlockSpec((br, 2), lambda i, j: (i, 0))],
        out_specs=pl.BlockSpec((br, bl), lambda i, j: (i, j)),
        out_shape=jax.ShapeDtypeStruct((R, L), out_dtype),
        compiler_params=_cparams(("parallel", "parallel")),
    )(x2, params)


def normalize_lanes(x2, params, out_dtype, tiles=None):
    """out[k, w] = x2[k, w] * params[0, w] + params[1, w]  (lane-dense hot path)."""
    K, W = x2.shape
    bk, bw = tiles if tiles is not None else _pick_tiles(K, W, x2.dtype.itemsize)
    grid = (pl.cdiv(K, bk), pl.cdiv(W, bw))
    return pl.pallas_call(
        _normalize_lanes_kernel,
        grid=grid,
        in_specs=[pl.BlockSpec((bk, bw), lambda i, j: (i, j)),
                  pl.BlockSpec((2, bw), lambda i, j: (0, j))],
        out_specs=pl.BlockSpec((bk, bw), lambda i, j: (i, j)),
        out_shape=jax.ShapeDtypeStruct((K, W), out_dtype),
        compiler_params=_cparams(("parallel", "parallel")),
    )(x2, params)


# ------------------------------- jitted glue --------------------------------

@partial(jax.jit, static_argnames=("k", "phase", "momentum"))
def _welford_update(s, mean, var, n, *, k, phase, momentum):
    """Running mean/var update from per-sample channel means s of shape (K, C)."""
    m = jnp.mean(s, axis=0)
    if phase == 0:                              # first batch ever
        old_mean, new_mean = m, m
    elif phase == 1:                            # n < period: exact pooled update
        old_mean = mean
        new_mean = mean + k * (m - mean) / (n + k)
    else:                                       # EMA regime
        old_mean = mean
        new_mean = (1.0 - momentum) * mean + momentum * m
    v = jnp.mean((s - old_mean[None, :]) * (s - new_mean[None, :]), axis=0)
    if phase == 0:
        new_var = v
    elif phase == 1:
        new_var = (n * var + k * v) / (n + k)
    else:
        new_var = (1.0 - momentum) * var + momentum * v
    return new_mean, new_var


@partial(jax.jit, static_argnames=("center", "eps"))
def _scale_shift(mean, var, mask, b, *, center, eps):
    """Per-channel scale = 1/(std+eps) and shift = -mean*scale (0 if not centered)."""
    std = jnp.sqrt(var)
    std = jnp.where(jnp.isnan(std), b, std)
    std = jnp.where(std < eps, b, std)
    if mask is not None:
        mean = mean * mask
        std = jnp.where(~mask, 1.0, std)
    scale = 1.0 / (std + eps)
    shift = -mean * scale if center else jnp.zeros_like(scale)
    return scale, shift


# ------------------------- module-equivalent wrapper ------------------------

class Standardize:
    """JAX/Pallas port of the PyTorch Standardize module (forward pass)."""
    eps = 1e-8

    def __init__(self, num_features, momentum=1e-4, center=True, dim=-1, mask=None):
        self.num_features = num_features
        self.momentum = momentum
        self.period = int(2 / momentum)
        self.center = center
        self.dim = dim
        assert mask is None or (mask.dtype == jnp.bool_ and mask.ndim == 1
                                and mask.shape[0] == num_features)
        self.mask = mask
        self.training = True
        # Running state, identical to the torch buffers at init.
        self.n = 0
        self.mean = jnp.zeros((num_features,), jnp.float32)
        self.var = jnp.zeros((num_features,), jnp.float32)
        # TODO(synk): the multiprocessing lock / shared-memory synchronization of the
        # torch module has no Pallas equivalent; running stats are host-side Python
        # state here (do not wrap __call__ in jax.jit - the n-dependent branches and
        # in-place state updates would bake in / be lost).

    def __call__(self, x):
        ndims = x.ndim
        d = ndims + self.dim if self.dim < 0 else self.dim
        C = self.num_features
        assert x.shape[d] == C

        K = math.prod(x.shape[:d])
        L = math.prod(x.shape[d + 1:])
        use_rows = L >= _LANE        # spatial axis already lane-dense -> (K*C, L)

        if self.training:
            k = max(1, K)
            if use_rows:
                # Pallas spatial mean over L, f32 accumulation, native-dtype streaming.
                s = row_mean(x.reshape(K * C, L)).reshape(K, C)
            else:
                # Small L (e.g. default dim=-1, L==1): plain XLA reduction is already
                # lane-dense / tiny; not worth a dedicated kernel.
                s = jnp.mean(x.reshape(K, C, L), axis=-1, dtype=jnp.float32)
            phase = 0 if self.n == 0 else (1 if self.n < self.period else 2)
            self.mean, self.var = _welford_update(
                s, self.mean, self.var, jnp.asarray(self.n, jnp.float32),
                k=k, phase=phase, momentum=self.momentum)
            self.n += k

        if self.n < self.period:
            b = 1.0 / (1.0 - (1.0 - self.momentum) ** max(1, self.n))
        else:
            b = 1.0
        scale, shift = _scale_shift(self.mean, self.var, self.mask,
                                    jnp.asarray(b, jnp.float32),
                                    center=self.center, eps=self.eps)

        out_dtype = x.dtype if jnp.issubdtype(x.dtype, jnp.floating) else jnp.float32

        if use_rows:
            # Row layout: per-row (scale, shift) packed into one (R, 2) f32 array.
            params = jnp.stack([jnp.tile(scale, K), jnp.tile(shift, K)], axis=1)
            out2 = normalize_rows(x.reshape(K * C, L), params, out_dtype)
        else:
            # Lane-dense layout: channel (x small L) on lanes, one resident (2, W) param.
            W = C * L
            scale_w = jnp.repeat(scale, L) if L > 1 else scale
            shift_w = jnp.repeat(shift, L) if L > 1 else shift
            params = jnp.stack([scale_w, shift_w], axis=0)
            out2 = normalize_lanes(x.reshape(K, W), params, out_dtype)
        return out2.reshape(x.shape)


# ------------------------------ pure-JAX reference --------------------------

def reference_forward(x, num_features, momentum=1e-4, center=True, dim=-1,
                      n=0, mean=None, var=None, mask=None, eps=1e-8):
    """Direct jnp transcription of the PyTorch forward (training mode).

    Returns (output, n, mean, var) so successive calls can be chained.
    """
    ndims = x.ndim
    d = ndims + dim if dim < 0 else dim
    period = int(2 / momentum)
    mean = jnp.zeros((num_features,), jnp.float32) if mean is None else mean
    var = jnp.zeros((num_features,), jnp.float32) if var is None else var
    pre_dims = tuple(range(d))
    post_dims = tuple(range(d + 1, ndims))
    s = jnp.mean(x, axis=post_dims) if post_dims else x
    k = max(1, math.prod(x.shape[:d]))
    m = jnp.mean(s, axis=pre_dims) if pre_dims else s
    if n == 0:
        old_mean, mean = m, m
    elif n < period:
        old_mean = mean
        mean = mean + k * (m - mean) / (n + k)
    else:
        old_mean = mean
        mean = (1 - momentum) * mean + momentum * m
    if pre_dims:
        expand = (1,) * d + (-1,)
        v = (s - old_mean.reshape(expand)) * (s - mean.reshape(expand))
        v = jnp.mean(v, axis=pre_dims)
    else:
        v = (s - old_mean) * (s - mean)
    if n == 0:
        var = v
    elif n < period:
        var = (n * var + k * v) / (n + k)
    else:
        var = (1 - momentum) * var + momentum * v
    n = n + k
    std = jnp.sqrt(var)
    b = 1.0 / (1.0 - (1.0 - momentum) ** max(1, n)) if n < period else 1.0
    std = jnp.where(jnp.isnan(std), b, std)
    std = jnp.where(std < eps, b, std)
    mean_o = mean if mask is None else mean * mask
    std_o = std if mask is None else jnp.where(~mask, 1.0, std)
    expand = (1,) * d + (num_features,) + (1,) * (ndims - d - 1)
    mean_b = mean_o.reshape(expand)
    std_b = std_o.reshape(expand)
    delta = x - mean_b if center else x
    return delta / (std_b + eps), n, mean, var


# ----------------------------------- main -----------------------------------

if __name__ == "__main__":
    key = jax.random.PRNGKey(0)
    k1, k2, k3, k4 = jax.random.split(key, 4)

    # --- component checks with FORCED small tiles (exercise L-tiling + tail mask) ---
    xa = jax.random.normal(k1, (16, 320), dtype=jnp.float32)
    s_p = row_mean(xa, tiles=(8, 128))                     # 3 lane steps, masked tail
    s_j = jnp.mean(xa, axis=-1, keepdims=True)
    assert bool(jnp.allclose(s_p, s_j, rtol=1e-5, atol=1e-5)), "row_mean mismatch"

    pr = jnp.stack([jnp.full((16,), 0.5, jnp.float32),
                    jnp.full((16,), -0.25, jnp.float32)], axis=1)
    o_p = normalize_rows(xa, pr, jnp.float32, tiles=(8, 128))
    assert bool(jnp.allclose(o_p, xa * 0.5 - 0.25, rtol=1e-6, atol=1e-6))

    xb = jax.random.normal(k2, (16, 256), dtype=jnp.float32)
    pw = jnp.stack([jnp.linspace(0.5, 2.0, 256, dtype=jnp.float32),
                    jnp.linspace(-1.0, 1.0, 256, dtype=jnp.float32)], axis=0)
    o_l = normalize_lanes(xb, pw, jnp.float32, tiles=(8, 128))
    assert bool(jnp.allclose(o_l, xb * pw[0:1] + pw[1:2], rtol=1e-6, atol=1e-6))

    # --- end-to-end: NCHW input, dim=-3 (row layout, Pallas spatial reduction) ---
    N, C, H, W = 2, 4, 16, 16
    # Deterministic per-sample offsets keep the cross-sample variance of the channel
    # means O(1) so the running std is well conditioned for the tolerance check.
    offs = jnp.arange(N, dtype=jnp.float32).reshape(N, 1, 1, 1)
    x1 = jax.random.normal(k3, (N, C, H, W), dtype=jnp.float32) + offs
    x2 = jax.random.normal(k4, (N, C, H, W), dtype=jnp.float32) + offs

    mod = Standardize(num_features=C, momentum=1e-4, center=True, dim=-3)
    out1 = mod(x1)
    out2 = mod(x2)

    ref1, n_r, mean_r, var_r = reference_forward(x1, C, momentum=1e-4, center=True, dim=-3)
    ref2, _, _, _ = reference_forward(x2, C, momentum=1e-4, center=True, dim=-3,
                                      n=n_r, mean=mean_r, var=var_r)
    assert out1.shape == x1.shape and out1.dtype == x1.dtype
    assert bool(jnp.all(jnp.isfinite(out1))) and bool(jnp.all(jnp.isfinite(out2)))
    assert bool(jnp.allclose(out1, ref1, rtol=1e-4, atol=1e-4)), "NCHW call-1 mismatch"
    assert bool(jnp.allclose(out2, ref2, rtol=1e-4, atol=1e-4)), "NCHW call-2 mismatch"

    # --- end-to-end: (N, C) with the DEFAULT dim=-1 (lane-dense layout) ---
    Kn, Cn = 8, 32
    xv1 = jax.random.normal(jax.random.PRNGKey(1), (Kn, Cn), dtype=jnp.float32)
    xv2 = jax.random.normal(jax.random.PRNGKey(2), (Kn, Cn), dtype=jnp.float32) + 0.5
    modv = Standardize(num_features=Cn, momentum=1e-4, center=True, dim=-1)
    ov1 = modv(xv1)
    ov2 = modv(xv2)
    rv1, n_v, mean_v, var_v = reference_forward(xv1, Cn, momentum=1e-4, center=True, dim=-1)
    rv2, _, _, _ = reference_forward(xv2, Cn, momentum=1e-4, center=True, dim=-1,
                                     n=n_v, mean=mean_v, var=var_v)
    assert ov1.dtype == xv1.dtype
    assert bool(jnp.allclose(ov1, rv1, rtol=1e-4, atol=1e-4)), "dim=-1 call-1 mismatch"
    assert bool(jnp.allclose(ov2, rv2, rtol=1e-4, atol=1e-4)), "dim=-1 call-2 mismatch"

    # --- dtype-matched output: bf16 in -> bf16 out (row layout) ---
    xb16 = (jax.random.normal(jax.random.PRNGKey(3), (N, C, H, W), dtype=jnp.float32)
            + offs).astype(jnp.bfloat16)
    modb = Standardize(num_features=C, momentum=1e-4, center=True, dim=-3)
    ob = modb(xb16)
    rb, _, _, _ = reference_forward(xb16.astype(jnp.float32), C, momentum=1e-4,
                                    center=True, dim=-3)
    assert ob.dtype == jnp.bfloat16, "output dtype should match input dtype"
    assert bool(jnp.allclose(ob.astype(jnp.float32), rb, rtol=5e-2, atol=1e-1)), \
        "bf16 mismatch"

    jax.block_until_ready(ob)
    print("KERNEL_OK")
</pallas_src>

<mosaic_0001>
module attributes {stable_mosaic.version = 11 : i64} {
  func.func @_row_sum_kernel(%arg0: i32, %arg1: i32, %arg2: memref<8x128xf32, #tpu.memory_space<vmem>>, %arg3: memref<8x1xf32, #tpu.memory_space<vmem>>) attributes {dimension_semantics = [#tpu.dimension_semantics<parallel>, #tpu.dimension_semantics<arbitrary>], iteration_bounds = array<i64: 2, 3>, scalar_prefetch = 0 : i64, scratch_operands = 0 : i64, tpu.core_type = #tpu.core_type<tc>, window_params = [{transform_indices = @transform_0, window_bounds = array<i64: 8, 128>}, {transform_indices = @transform_1, window_bounds = array<i64: 8, 1>}]} {
    %c0_i32 = arith.constant 0 : i32
    %0 = arith.cmpi eq, %arg1, %c0_i32 : i32
    %1 = arith.extui %0 : i1 to i32
    %c0_i32_0 = arith.constant 0 : i32
    %2 = arith.cmpi ne, %1, %c0_i32_0 : i32
    scf.if %2 {
      %cst_8 = arith.constant 0.000000e+00 : f32
      %20 = vector.broadcast %cst_8 : f32 to vector<8x1xf32>
      %c0_9 = arith.constant 0 : index
      %c0_10 = arith.constant 0 : index
      %21 = vector.load %arg3[%c0_9, %c0_10] : memref<8x1xf32, #tpu.memory_space<vmem>>, vector<8x1xf32>
      tpu.vector_store %arg3[%c0_9, %c0_10], %20 {strides = array<i32>} : memref<8x1xf32, #tpu.memory_space<vmem>>, vector<8x1xf32>,
    } else {
    }
    %c0 = arith.constant 0 : index
    %c0_1 = arith.constant 0 : index
    %3 = vector.load %arg2[%c0, %c0_1] : memref<8x128xf32, #tpu.memory_space<vmem>>, vector<8x128xf32>
    %4 = tpu.iota {dimensions = array<i32: 1>} : vector<8x128xi32>
    %c128_i32 = arith.constant 128 : i32
    %5 = arith.muli %arg1, %c128_i32 : i32
    %6 = vector.broadcast %5 : i32 to vector<8x128xi32>
    %7 = arith.addi %4, %6 : vector<8x128xi32>
    %c320_i32 = arith.constant 320 : i32
    %8 = vector.broadcast %c320_i32 : i32 to vector<8x128xi32>
    %9 = arith.cmpi slt, %7, %8 : vector<8x128xi32>
    %cst = arith.constant 0.000000e+00 : f32
    %10 = vector.broadcast %cst : f32 to vector<8x128xf32>
    %11 = arith.select %9, %3, %10 : vector<8x128xi1>, vector<8x128xf32>
    %c0_2 = arith.constant 0 : index
    %c0_3 = arith.constant 0 : index
    %12 = vector.load %arg3[%c0_2, %c0_3] : memref<8x1xf32, #tpu.memory_space<vmem>>, vector<8x1xf32>
    %cst_4 = arith.constant dense<0.000000e+00> : vector<8xf32>
    %13 = vector.multi_reduction <add>, %11, %cst_4 [1] : vector<8x128xf32> to vector<8xf32>
    %14 = vector.shape_cast %13 : vector<8xf32> to vector<8x1xf32>
    %15 = arith.addf %12, %14 : vector<8x1xf32>
    %c0_5 = arith.constant 0 : index
    %c0_6 = arith.constant 0 : index
    %16 = vector.load %arg3[%c0_5, %c0_6] : memref<8x1xf32, #tpu.memory_space<vmem>>, vector<8x1xf32>
    tpu.vector_store %arg3[%c0_5, %c0_6], %15 {strides = array<i32>} : memref<8x1xf32, #tpu.memory_space<vmem>>, vector<8x1xf32>,
    %c2_i32 = arith.constant 2 : i32
    %17 = arith.cmpi eq, %arg1, %c2_i32 : i32
    %18 = arith.extui %17 : i1 to i32
    %c0_i32_7 = arith.constant 0 : i32
    %19 = arith.cmpi ne, %18, %c0_i32_7 : i32
    scf.if %19 {
      %c0_8 = arith.constant 0 : index
      %c0_9 = arith.constant 0 : index
      %20 = vector.load %arg3[%c0_8, %c0_9] : memref<8x1xf32, #tpu.memory_space<vmem>>, vector<8x1xf32>
      %cst_10 = arith.constant 3.125000e-03 : f32
      %21 = vector.broadcast %cst_10 : f32 to vector<8x1xf32>
      %22 = arith.mulf %20, %21 : vector<8x1xf32>
      %c0_11 = arith.constant 0 : index
      %c0_12 = arith.constant 0 : index
      %23 = vector.load %arg3[%c0_11, %c0_12] : memref<8x1xf32, #tpu.memory_space<vmem>>, vector<8x1xf32>
      tpu.vector_store %arg3[%c0_11, %c0_12], %22 {strides = array<i32>} : memref<8x1xf32, #tpu.memory_space<vmem>>, vector<8x1xf32>,
    } else {
    }
    return
  }
  func.func @transform_0(%arg0: i32, %arg1: i32) -> (i32, i32) {
    %c0_i32 = arith.constant 0 : i32
    return %arg0, %arg1 : i32, i32
  }
  func.func @transform_1(%arg0: i32, %arg1: i32) -> (i32, i32) {
    %c0_i32 = arith.constant 0 : i32
    %c0_i32_0 = arith.constant 0 : i32
    return %arg0, %c0_i32 : i32, i32
  }
}

</mosaic_0001>

<bundles_post_ra>
// kernel: tpu_custom_call.1
= control target key start
LH: loop header
LB: loop body
LE: loop exit
PB: predicated region body
PF: predicated region fallthrough
CT: control target
= control target key end

     0   :  { %6 = vsyncpa [#allocation3], 0  ;;  %s603_s0 = inlined_call_operand.hbm [shape: f32[16,320], index: 0, kind: input, shape index: {}]   ;;  %s604_s1 = inlined_call_operand.vmem [shape: f32[16,1], index: 1, kind: output, shape index: {}]  }
   0x1   :  { %8 = vsyncpa [#allocation3 + $0x1], 0  ;;  %s450_s6 = smov 0   ;;  %s452_s7 = smov 0  }
   0x2   :  { %s454_s8 = smov 0   ;;  %s456_s9 = smov 0  }
   0x3   :  { %s458_s10 = smov 0   ;;  %s460_s11 = smov 0  }
   0x4   :  { %s462_s12 = smov 0   ;;  %s464_s13 = smov 0  }
   0x5 LB: > { %s253_s14 = sadd.s32 4294967295, %s436_s13   ;;  %s23_s15 = sadd.s32 1, %s428_s11  ;;  %s436_s13 = sphi %s464_s13, %s14_s13   ;;  %s432_s12 = sphi %s462_s12, %s616_s12   ;;  %s428_s11 = sphi %s460_s11, %s615_s11   ;;  %s424_s10 = sphi %s458_s10, %s614_s10   ;;  %s420_s9 = sphi %s456_s9, %s613_s9   ;;  %s416_s8 = sphi %s454_s8, %s612_s8   ;;  %s412_s7 = sphi %s452_s7, %s611_s7   ;;  %s408_s6 = sphi %s450_s6, %s610_s6  }
   0x6   : > { %p24_p0 = scmp.ge.s32.totalorder %s23_s15, 3  ;;  %s26_s16 = sadd.s32 1, %s432_s12 }
   0x7   : > { %s35_s17 = sadd.s32 1, %s416_s8  ;;  %p42_p1 = scmp.ne.s32.totalorder %s416_s8, %s412_s7 }
   0x8   : > { %s618_s15 = smov (%p24_p0, %s23_s15), 0  ;;  %s620_s16 = smov (!%p24_p0, %s26_s16), %s432_s12 }
   0x9   : > { %s31_s18 = ssub.s32 %s428_s11, %s618_s15  ;;  %p43_p2 = scmp.eq.s32.totalorder %s436_s13, 0 }
   0xa   : > { %p28_p3 = scmp.ge.s32.totalorder %s620_s16, 2  ;;  %p48_p4 = scmp.ne.s32.totalorder %s412_s7, %s408_s6 }
   0xb   : > { %p501_p5 = por %p43_p2, %p42_p1  ;;  %p49_p6 = scmp.eq.s32.totalorder %s253_s14, 0 }
   0xc   : > { %s622_s16 = smov (%p28_p3, %s620_s16), 0  ;;  %p274_p8 = scmp.lt.s32.totalorder %s436_s13, 6 }
   0xd   : > { %p507_p7 = por %p49_p6, %p48_p4  ;;  %s30_s21 = ssub.s32 %s432_s12, %s622_s16 }
   0xe   : > { %s32_s22 = sor.u32 %s31_s18, %s30_s21  ;;  %s98_s23 = sand.u32 1, %s416_s8  }
   0xf   : > { %p33_p9 = scmp.eq.s32.totalorder %s32_s22, 0  ;;  %s257_s24 = sshll.u32 %s98_s23, 3 }
  0x10   : > { %s267_s25 = smul.u32 3, %s432_s12  ;;  %s102_s29 = scalar_lea.vmem [#allocation2], %s257_s24 }
  0x11   : > { %s517_s26 = scalar_select %p33_p9, %s416_s8, %s35_s17  }
  0x12   : > { %s107_s27 = sadd.s32 %s428_s11, %s267_s25  ;;  %s111_s30 = sshll.u32 %s102_s29, 4  ;;  %s525_s30 = int_to_ptr.vmem [resolvable:$true] %s111_s30 }
  0x13   : > { %s258_s28 = sshll.u32 %s107_s27, 7  ;;  %p531_p10 = pnand %p274_p8, %p501_p5 }
  0x14   : > { %s523_s4 = scalar_lea.hbm %s603_s0, %s258_s28  ;;  %s99_s6 = scalar_lea.sflag [#allocation3], %s98_s23 }
  0x15   : > { %s340_s14 = scalar_lea.hbm %s523_s4, 128  ;;  %p342_p0 = pneg %p531_p10 }
  0x16   : > { %p341_p13 = scmp.ne.s32.totalorder %s523_s4, %s340_s14  ;;  %s345_s19 = scalar_lea.hbm %s603_s0, 768 }
  0x17   : > { %p346_p3 = scmp.lt.u32.totalorder %s523_s4, %s603_s0  ;;  %p347_p4 = scmp.lt.u32.totalorder %s345_s19, %s340_s14 }
  0x18   : > { %p343_p1 = pnand %p342_p0, %p341_p13  ;;  %p349_p6 = scmp.lt.u32.totalorder %s340_s14, %s523_s4 }
  0x19   : > { %p348_p5 = por %p347_p4, %p346_p3 }
  0x1a   : > { %p344_p2 = pneg %p343_p1 }
  0x1b   : > { %p350_p8 = por %p349_p6, %p348_p5 }
  0x1d   : > { %p351_p9 = pnand %p350_p8, %p344_p2 }
  0x1f   : > { %354 = shalt.err (!%p351_p9)
}
  0x20   : > { %s355_s23 = scalar_lea.vmem %s525_s30, 128  ;;  %s438_s24 = smov [#allocation2]  }
  0x21   : > { %p356_p13 = scmp.ne.s32.totalorder %s525_s30, %s355_s23  ;;  %s360_s25 = sshll.u32 %s438_s24, 4  ;;  %s361_s25 = int_to_ptr.vmem [resolvable:$false] %s360_s25 }
  0x22   : > { %s362_s27 = scalar_lea.vmem %s361_s25, 256  ;;  %p363_p12 = scmp.lt.s32.totalorder %s525_s30, %s361_s25 }
  0x23   : > { %p358_p1 = pnand %p356_p13, %p342_p0  ;;  %p364_p3 = scmp.lt.s32.totalorder %s362_s27, %s355_s23 }
  0x25   : > { %p359_p11 = pneg %p358_p1  ;;  %p365_p4 = por %p364_p3, %p363_p12 }
  0x27   : > { %p366_p5 = pnand %p365_p4, %p359_p11 }
  0x29   : > { %369 = shalt.err (!%p366_p5)
}
  0x2a   : > { %273 = dma.hbm_to_vmem [thread:$0]  (!%p531_p10), %s523_s4, 128, %s525_s30, %s99_s6  }
  0x2b   : > { %p608_p2 = scmp.lt.s32.totalorder %s436_s13, 7  ;;  %p609_p6 = scmp.ge.s32.totalorder %s436_s13, 1 }
  0x2d   : > { %p117_p0 = pnand %p609_p6, %p608_p2 }
  0x2e   : > { %s122_s28 = sand.u32 (!%p117_p0), 1, %s412_s7  }
  0x2f   : > { %120 = sbr.rel (%p117_p0) target bundleno = 227 (0xe3), region = 24  ;;  %s260_s29 = sshll.u32 (!%p117_p0), %s122_s28, 3 }
  0x30   : > { %s123_s2 = scalar_lea.sflag (!%p117_p0), [#allocation3], %s122_s28  ;;  %s126_s3 = scalar_lea.vmem (!%p117_p0), [#allocation2], %s260_s29 }
  0x36   : > { %403 = dma.done.wait (%p507_p7), %s123_s2, 128  }
  0x37   : > { %405 = vsyncadd (%p507_p7), %s123_s2, 4294967168  ;;  %p144_p11 = scmp.lt.s32.totalorder %s424_s10, 1  ;;  %p262_p10 = scmp.ne.s32.totalorder %s420_s9, 0 }
  0x38   : > { %vm152_vm0 = vcmask (!%p262_p10), 7168   ;;  %v439_v0 = vmov (!%p262_p10), 0.0  }
  0x39   : > { %s624_s10 = smov (!%p144_p11, %s424_s10), 1  ;;  %151 = sbr.rel (%p262_p10) target bundleno = 64 (0x40), region = 32 }
  0x3a   : > { %s261_s30 = sshll.u32 %s624_s10, 3 }
  0x3b   : > { %s147_s6 = scalar_lea.vmem %s604_s1, %s261_s30 }
  0x3c   : > { %153 = vst.msk [vmem:[%s147_s6] sm:$0xff] (!%p262_p10), %vm152_vm0, %v439_v0 }
  0x40 PF: > { %v155_v1 = vlaneseq  ;;  %s263_s20 = sshll.u32 %s420_s9, 7  ;;  %v154_v4 = vld [vmem:[%s126_s3] sm:$0xff]  ;;  %vm166_vm2 = vcmask 7168   ;;  %p264_p7 = scmp.ne.s32.totalorder %s420_s9, 2 }
  0x41   : > { %v158_v2 = vstv %s263_s20 }
  0x42   : > { %v156_v3 = vand.u32 127, %v155_v1 }
  0x43   : > { %v162_v7 = vld [vmem:[%s147_s6] sm:$0xff] }
  0x44   : > { %v159_v5 = vadd.s32 %v158_v2, %v156_v3 }
  0x46   : > { %vm160_vm1 = vcmp.lt.s32.totalorder %v159_v5, 320 }
  0x47   : > { %v161_v6 = vsel %vm160_vm1, %v154_v4, 0.0 }
  0x48   : > { %163 = vadd.xlane.f32.xlu0 %v161_v6 }
  0xd2   : > { %171 = sbr.rel (%p264_p7) target bundleno = 227 (0xe3), region = 36 }
  0xd5   : > { %v164_v8 = vpop.xlane.xlu0 %163 }
  0xd6   : > { %v165_v9 = vadd.f32 %v164_v8, %v162_v7 }
  0xd8   : > { %167 = vst.msk [vmem:[%s147_s6] sm:$0xff] %vm166_vm2, %v165_v9 }
  0xdf   : > { %v172_v10 = vld [vmem:[%s147_s6] sm:$0xff] }
  0xe0   : > { %v173_v11 = vmul.f32 0.003125, %v172_v10 }
  0xe2   : > { %174 = vst.msk [vmem:[%s147_s6] sm:$0xff] %vm166_vm2, %v173_v11 }
  0xe3 PF: > { %s14_s13 = sadd.s32 1, %s436_s13   ;;  %s610_s6 = smov %s412_s7 }
  0xe4   : > { %p11_p12 = scmp.ge.s32.totalorder %s14_s13, 8   ;;  %s611_s7 = smov %s416_s8 }
  0xe5   : > { %s612_s8 = smov %s517_s26  ;;  %s613_s9 = smov %s428_s11 }
  0xe6   : > { %s614_s10 = smov %s432_s12  ;;  %s615_s11 = smov %s618_s15 }
  0xe7   : > { %s616_s12 = smov %s622_s16  ;;  %13 = sbr.rel (!%p11_p12) target bundleno = 5 (0x5), region = 72 }
  0xee   :  { %194 = vsyncpa [#allocation3], 1 }
  0xef   :  { %196 = vsyncpa [#allocation3 + $0x1], 1 }

</bundles_post_ra>
